<compile_context>
chip_gen: v7x
topology: tpu7x:2x2x1
jax: 0.10.0
libtpu: 0.0.40
codegen_flags: <defaults>
</compile_context>

<pallas_src>
import numpy as np
import jax
import jax.numpy as jnp
from jax.experimental import pallas as pl
from jax.experimental.pallas import tpu as pltpu


# ----------------------------------------------------------------------------
# Fused kernel: one batch image per grid step.
#   p_ref  : [1, P_b, h*w]   im2col patches (+ ones bias row, + zero pad rows)
#   wp_ref : [Cout, P_b]     fused weight  [ wc@wf | wc@bf+bc | 0 ]
#   awt_ref: [w, W]  f32     bilinear A_w^T (align_corners=True)
#   ah_ref : [H, h]  f32     bilinear A_h
#   o_ref  : [1, Cout, H, W] NCHW output block
#   mid_ref: [h, Cout, W]    f32 VMEM scratch holding the W-pass result
# ----------------------------------------------------------------------------
def fused_mask_head_kernel(p_ref, wp_ref, awt_ref, ah_ref, o_ref, mid_ref):
    cout = wp_ref.shape[0]
    w = awt_ref.shape[0]
    h = ah_ref.shape[1]

    # Fused (feature stub ∘ 1x1 conv) affine head; the bias rides along in the
    # contraction via the constant ones-row -> a single MXU matmul, f32 accumulation.
    logits = jnp.dot(wp_ref[...], p_ref[0],
                     preferred_element_type=jnp.float32)             # [Cout, h*w]

    # Separable bilinear x8 upsample, W-pass: one [Cout, w] @ [w, W] matmul per source
    # row (static lane-slices of the tiny logits; avoids any lane->sublane relayout and
    # any broadcast copies of the coefficient matrix).  Staged in VMEM scratch.
    for i in range(h):
        mid_ref[i] = jnp.dot(logits[:, i * w:(i + 1) * w], awt_ref[...],
                             preferred_element_type=jnp.float32)     # [Cout, W]

    # H-pass: one [H, h] @ [h, W] matmul per class, written straight to the NCHW
    # output block (W is the lane dim -> dense stores at real sizes).
    for c in range(cout):
        o_ref[0, c] = jnp.dot(ah_ref[...], mid_ref[:, c, :],
                              preferred_element_type=jnp.float32
                              ).astype(o_ref.dtype)


# ----------------------------------------------------------------------------
# Bilinear interpolation matrix, PyTorch UpsamplingBilinear2d (align_corners=True).
# ----------------------------------------------------------------------------
def _bilinear_matrix_align_corners(s_in: int, s_out: int) -> np.ndarray:
    if s_in == 1:
        return np.ones((s_out, 1), dtype=np.float32)
    src = np.arange(s_out, dtype=np.float64) * (s_in - 1) / (s_out - 1)
    lo = np.clip(np.floor(src).astype(np.int64), 0, s_in - 2)
    frac = src - lo
    A = np.zeros((s_out, s_in), dtype=np.float64)
    A[np.arange(s_out), lo] = 1.0 - frac
    A[np.arange(s_out), lo + 1] = frac
    return A.astype(np.float32)


# ----------------------------------------------------------------------------
# Wrapper: im2col + weight/bias fusion (XLA-side layout glue) + ONE pallas_call.
# ----------------------------------------------------------------------------
def mask_detector_forward(x, wf, bf, wc, bc,
                          compute_dtype=jnp.bfloat16,
                          out_dtype=jnp.float32):
    """x: [N, Cin, H, W] f32 (NCHW).  Returns [N, Cout, H, W] in out_dtype.

    compute_dtype: dtype of the head-matmul operands (patches / fused weight).  bf16 by
    default on all generations -- the kernel is memory bound and accumulation stays f32.
    Bilinear coefficients and the upsample math stay f32."""
    N, Cin, H, W = x.shape
    K = 8                                     # FPN-stub stride == upsample factor
    assert H % K == 0 and W % K == 0
    h, w = H // K, W // K
    hw = h * w
    Cout = wc.shape[0]
    P = Cin * K * K

    # im2col for the stride-8 / kernel-8 patch-embed stub.  Rows ordered (cin, ki, kj);
    # columns = (i, j) spatial positions, lane-dense.  The transpose + ones-row concat +
    # dtype cast fuse into a single XLA copy over x.
    patches = x.reshape(N, Cin, h, K, w, K)
    patches = jnp.transpose(patches, (0, 1, 3, 5, 2, 4)).reshape(N, P, hw)

    # Fold the two linear layers into one affine (exact: everything between is linear),
    # then fold the bias into the contraction (ones-row in patches / extra column in W').
    wp = jnp.dot(wc.astype(jnp.float32), wf.astype(jnp.float32))            # [Cout, P]
    bp = (jnp.dot(wc.astype(jnp.float32), bf.astype(jnp.float32))
          + bc.astype(jnp.float32))                                         # [Cout]

    # Pad the contraction dim only to a sublane multiple (8); padding to 128 would add
    # ~33% useless HBM traffic on the dominant, memory-bound patches stream.
    P_b = ((P + 1 + 7) // 8) * 8
    patches = jnp.concatenate(
        [patches,
         jnp.ones((N, 1, hw), dtype=patches.dtype),
         jnp.zeros((N, P_b - P - 1, hw), dtype=patches.dtype)], axis=1)
    wp_aug = jnp.concatenate(
        [wp, bp[:, None], jnp.zeros((Cout, P_b - P - 1), dtype=jnp.float32)], axis=1)

    patches = patches.astype(compute_dtype)     # bf16 halves the dominant HBM read
    wp_aug = wp_aug.astype(compute_dtype)

    # Bilinear x8 interpolation matrices (align_corners=True), kept in f32.
    awt = jnp.asarray(_bilinear_matrix_align_corners(w, W).T)   # [w, W]
    ah = jnp.asarray(_bilinear_matrix_align_corners(h, H))      # [H, h]

    return pl.pallas_call(
        fused_mask_head_kernel,
        out_shape=jax.ShapeDtypeStruct((N, Cout, H, W), out_dtype),
        grid_spec=pltpu.PrefetchScalarGridSpec(
            num_scalar_prefetch=0,
            grid=(N,),                       # N>=2 -> >=2 parallel steps (both v7x TCs)
            in_specs=[
                pl.BlockSpec((1, P_b, hw), lambda n: (n, 0, 0)),
                pl.BlockSpec((Cout, P_b), lambda n: (0, 0)),
                pl.BlockSpec((w, W), lambda n: (0, 0)),
                pl.BlockSpec((H, h), lambda n: (0, 0)),
            ],
            out_specs=pl.BlockSpec((1, Cout, H, W), lambda n: (n, 0, 0, 0)),
            scratch_shapes=[pltpu.VMEM((h, Cout, W), jnp.float32)],
        ),
        compiler_params=pltpu.CompilerParams(
            dimension_semantics=("parallel",)),
    )(patches, wp_aug, awt, ah)


# Pure-JAX reference of the same math (unfused, separable upsample) for correctness.
def _reference_forward(x, wf, bf, wc, bc):
    N, Cin, H, W = x.shape
    K = 8
    h, w = H // K, W // K
    patches = x.reshape(N, Cin, h, K, w, K)
    patches = jnp.transpose(patches, (0, 1, 3, 5, 2, 4)).reshape(N, Cin * K * K, h * w)
    feat = jnp.einsum('fp,npk->nfk', wf, patches) + bf[None, :, None]
    logits = jnp.einsum('cf,nfk->nck', wc, feat) + bc[None, :, None]
    logits = logits.reshape(N, -1, h, w)
    Ah = jnp.asarray(_bilinear_matrix_align_corners(h, H))
    Aw = jnp.asarray(_bilinear_matrix_align_corners(w, W))
    return jnp.einsum('yh,nchw,xw->ncyx', Ah, logits, Aw)


if __name__ == "__main__":
    # Module defaults: in_channels=3, num_classes=2, act='sigmoid' -> label_offset=0.
    N, Cin, H, W = 2, 3, 16, 16
    Cf = 32                    # FPN-stub output channels (feature_extractor.cout)
    Cout = 2                   # num_classes + label_offset

    key = jax.random.PRNGKey(0)
    kx, kwf, kbf, kwc, kbc = jax.random.split(key, 5)

    x = jax.random.normal(kx, (N, Cin, H, W), dtype=jnp.float32)
    wf = jax.random.normal(kwf, (Cf, Cin * 8 * 8), dtype=jnp.float32) * 0.05
    bf = jax.random.normal(kbf, (Cf,), dtype=jnp.float32) * 0.01
    wc = jax.random.normal(kwc, (Cout, Cf), dtype=jnp.float32) * 0.1
    bc = jax.random.normal(kbc, (Cout,), dtype=jnp.float32) * 0.01

    ref = jax.block_until_ready(_reference_forward(x, wf, bf, wc, bc))

    # Exact-arithmetic path (f32 operands): tight check.
    out_f32 = jax.block_until_ready(
        mask_detector_forward(x, wf, bf, wc, bc, compute_dtype=jnp.float32))
    assert out_f32.shape == (N, Cout, H, W), out_f32.shape
    assert np.allclose(np.asarray(out_f32), np.asarray(ref), atol=2e-4, rtol=2e-4)

    # Default fast path (bf16 head operands, f32 accumulation): loose check.
    out_bf16 = jax.block_until_ready(mask_detector_forward(x, wf, bf, wc, bc))
    assert out_bf16.shape == (N, Cout, H, W), out_bf16.shape
    assert np.allclose(np.asarray(out_bf16), np.asarray(ref), atol=5e-2, rtol=5e-2)

    print("KERNEL_OK")
</pallas_src>

<mosaic_0001>
module attributes {stable_mosaic.version = 11 : i64} {
  func.func @fused_mask_head_kernel(%arg0: i32, %arg1: memref<1x200x4xf32, #tpu.memory_space<vmem>>, %arg2: memref<2x200xf32, #tpu.memory_space<vmem>>, %arg3: memref<2x16xf32, #tpu.memory_space<vmem>>, %arg4: memref<16x2xf32, #tpu.memory_space<vmem>>, %arg5: memref<1x2x16x16xf32, #tpu.memory_space<vmem>>, %arg6: memref<2x2x16xf32, #tpu.memory_space<vmem>>) attributes {dimension_semantics = [#tpu.dimension_semantics<parallel>], iteration_bounds = array<i64: 2>, scalar_prefetch = 0 : i64, scratch_operands = 1 : i64, tpu.core_type = #tpu.core_type<tc>, window_params = [{transform_indices = @transform_0, window_bounds = array<i64: 1, 200, 4>}, {pipeline_mode = #tpu.pipeline_mode<synchronous>, transform_indices = @transform_1, window_bounds = array<i64: 2, 200>}, {pipeline_mode = #tpu.pipeline_mode<synchronous>, transform_indices = @transform_2, window_bounds = array<i64: 2, 16>}, {pipeline_mode = #tpu.pipeline_mode<synchronous>, transform_indices = @transform_3, window_bounds = array<i64: 16, 2>}, {transform_indices = @transform_4, window_bounds = array<i64: 1, 2, 16, 16>}]} {
    %c0 = arith.constant 0 : index
    %c0_0 = arith.constant 0 : index
    %0 = vector.load %arg2[%c0, %c0_0] : memref<2x200xf32, #tpu.memory_space<vmem>>, vector<2x200xf32>
    %c0_1 = arith.constant 0 : index
    %c0_2 = arith.constant 0 : index
    %c0_3 = arith.constant 0 : index
    %1 = vector.load %arg1[%c0_1, %c0_2, %c0_3] : memref<1x200x4xf32, #tpu.memory_space<vmem>>, vector<1x200x4xf32>
    %2 = vector.shape_cast %1 : vector<1x200x4xf32> to vector<200x4xf32>
    %cst = arith.constant dense<0.000000e+00> : vector<2x4xf32>
    %3 = tpu.matmul %0, %2, %cst {dimension_numbers = #tpu.dot_dimension_numbers<[1], [0], [0], [1], [0, 0, 1, 1], [], []>} : vector<2x200xf32>, vector<200x4xf32>, vector<2x4xf32> -> vector<2x4xf32>
    %4 = vector.extract_strided_slice %3 {offsets = [0, 0], sizes = [2, 2], strides = [1, 1]} : vector<2x4xf32> to vector<2x2xf32>
    %c0_4 = arith.constant 0 : index
    %c0_5 = arith.constant 0 : index
    %5 = vector.load %arg3[%c0_4, %c0_5] : memref<2x16xf32, #tpu.memory_space<vmem>>, vector<2x16xf32>
    %cst_6 = arith.constant dense<0.000000e+00> : vector<2x16xf32>
    %6 = tpu.matmul %4, %5, %cst_6 {dimension_numbers = #tpu.dot_dimension_numbers<[1], [0], [0], [1], [0, 0, 1, 1], [], []>} : vector<2x2xf32>, vector<2x16xf32>, vector<2x16xf32> -> vector<2x16xf32>
    %c0_7 = arith.constant 0 : index
    %c0_8 = arith.constant 0 : index
    %c0_9 = arith.constant 0 : index
    %7 = vector.load %arg6[%c0_7, %c0_8, %c0_9] : memref<2x2x16xf32, #tpu.memory_space<vmem>>, vector<1x2x16xf32>
    %8 = vector.shape_cast %7 : vector<1x2x16xf32> to vector<2x16xf32>
    %9 = vector.shape_cast %6 : vector<2x16xf32> to vector<1x2x16xf32>
    tpu.vector_store %arg6[%c0_7, %c0_8, %c0_9], %9 {strides = array<i32>} : memref<2x2x16xf32, #tpu.memory_space<vmem>>, vector<1x2x16xf32>,
    %10 = vector.extract_strided_slice %3 {offsets = [0, 2], sizes = [2, 2], strides = [1, 1]} : vector<2x4xf32> to vector<2x2xf32>
    %c0_10 = arith.constant 0 : index
    %c0_11 = arith.constant 0 : index
    %11 = vector.load %arg3[%c0_10, %c0_11] : memref<2x16xf32, #tpu.memory_space<vmem>>, vector<2x16xf32>
    %cst_12 = arith.constant dense<0.000000e+00> : vector<2x16xf32>
    %12 = tpu.matmul %10, %11, %cst_12 {dimension_numbers = #tpu.dot_dimension_numbers<[1], [0], [0], [1], [0, 0, 1, 1], [], []>} : vector<2x2xf32>, vector<2x16xf32>, vector<2x16xf32> -> vector<2x16xf32>
    %c1 = arith.constant 1 : index
    %c0_13 = arith.constant 0 : index
    %c0_14 = arith.constant 0 : index
    %13 = vector.load %arg6[%c1, %c0_13, %c0_14] : memref<2x2x16xf32, #tpu.memory_space<vmem>>, vector<1x2x16xf32>
    %14 = vector.shape_cast %13 : vector<1x2x16xf32> to vector<2x16xf32>
    %15 = vector.shape_cast %12 : vector<2x16xf32> to vector<1x2x16xf32>
    tpu.vector_store %arg6[%c1, %c0_13, %c0_14], %15 {strides = array<i32>} : memref<2x2x16xf32, #tpu.memory_space<vmem>>, vector<1x2x16xf32>,
    %c0_15 = arith.constant 0 : index
    %c0_16 = arith.constant 0 : index
    %16 = vector.load %arg4[%c0_15, %c0_16] : memref<16x2xf32, #tpu.memory_space<vmem>>, vector<16x2xf32>
    %c0_17 = arith.constant 0 : index
    %c0_18 = arith.constant 0 : index
    %c0_19 = arith.constant 0 : index
    %17 = vector.load %arg6[%c0_17, %c0_18, %c0_19] : memref<2x2x16xf32, #tpu.memory_space<vmem>>, vector<2x1x16xf32>
    %18 = vector.shape_cast %17 : vector<2x1x16xf32> to vector<2x16xf32>
    %cst_20 = arith.constant dense<0.000000e+00> : vector<16x16xf32>
    %19 = tpu.matmul %16, %18, %cst_20 {dimension_numbers = #tpu.dot_dimension_numbers<[1], [0], [0], [1], [0, 0, 1, 1], [], []>} : vector<16x2xf32>, vector<2x16xf32>, vector<16x16xf32> -> vector<16x16xf32>
    %c0_21 = arith.constant 0 : index
    %c0_22 = arith.constant 0 : index
    %c0_23 = arith.constant 0 : index
    %c0_24 = arith.constant 0 : index
    %20 = vector.load %arg5[%c0_21, %c0_22, %c0_23, %c0_24] : memref<1x2x16x16xf32, #tpu.memory_space<vmem>>, vector<1x1x16x16xf32>
    %21 = vector.shape_cast %20 : vector<1x1x16x16xf32> to vector<16x16xf32>
    %22 = vector.shape_cast %19 : vector<16x16xf32> to vector<1x1x16x16xf32>
    tpu.vector_store %arg5[%c0_21, %c0_22, %c0_23, %c0_24], %22 {strides = array<i32>} : memref<1x2x16x16xf32, #tpu.memory_space<vmem>>, vector<1x1x16x16xf32>,
    %c0_25 = arith.constant 0 : index
    %c0_26 = arith.constant 0 : index
    %23 = vector.load %arg4[%c0_25, %c0_26] : memref<16x2xf32, #tpu.memory_space<vmem>>, vector<16x2xf32>
    %c0_27 = arith.constant 0 : index
    %c1_28 = arith.constant 1 : index
    %c0_29 = arith.constant 0 : index
    %24 = vector.load %arg6[%c0_27, %c1_28, %c0_29] : memref<2x2x16xf32, #tpu.memory_space<vmem>>, vector<2x1x16xf32>
    %25 = vector.shape_cast %24 : vector<2x1x16xf32> to vector<2x16xf32>
    %cst_30 = arith.constant dense<0.000000e+00> : vector<16x16xf32>
    %26 = tpu.matmul %23, %25, %cst_30 {dimension_numbers = #tpu.dot_dimension_numbers<[1], [0], [0], [1], [0, 0, 1, 1], [], []>} : vector<16x2xf32>, vector<2x16xf32>, vector<16x16xf32> -> vector<16x16xf32>
    %c0_31 = arith.constant 0 : index
    %c1_32 = arith.constant 1 : index
    %c0_33 = arith.constant 0 : index
    %c0_34 = arith.constant 0 : index
    %27 = vector.load %arg5[%c0_31, %c1_32, %c0_33, %c0_34] : memref<1x2x16x16xf32, #tpu.memory_space<vmem>>, vector<1x1x16x16xf32>
    %28 = vector.shape_cast %27 : vector<1x1x16x16xf32> to vector<16x16xf32>
    %29 = vector.shape_cast %26 : vector<16x16xf32> to vector<1x1x16x16xf32>
    tpu.vector_store %arg5[%c0_31, %c1_32, %c0_33, %c0_34], %29 {strides = array<i32>} : memref<1x2x16x16xf32, #tpu.memory_space<vmem>>, vector<1x1x16x16xf32>,
    return
  }
  func.func @transform_0(%arg0: i32) -> (i32, i32, i32) {
    %c0_i32 = arith.constant 0 : i32
    %c0_i32_0 = arith.constant 0 : i32
    %c0_i32_1 = arith.constant 0 : i32
    return %arg0, %c0_i32, %c0_i32_0 : i32, i32, i32
  }
  func.func @transform_1(%arg0: i32) -> (i32, i32) {
    %c0_i32 = arith.constant 0 : i32
    %c0_i32_0 = arith.constant 0 : i32
    %c0_i32_1 = arith.constant 0 : i32
    return %c0_i32, %c0_i32_0 : i32, i32
  }
  func.func @transform_2(%arg0: i32) -> (i32, i32) {
    %c0_i32 = arith.constant 0 : i32
    %c0_i32_0 = arith.constant 0 : i32
    %c0_i32_1 = arith.constant 0 : i32
    return %c0_i32, %c0_i32_0 : i32, i32
  }
  func.func @transform_3(%arg0: i32) -> (i32, i32) {
    %c0_i32 = arith.constant 0 : i32
    %c0_i32_0 = arith.constant 0 : i32
    %c0_i32_1 = arith.constant 0 : i32
    return %c0_i32, %c0_i32_0 : i32, i32
  }
  func.func @transform_4(%arg0: i32) -> (i32, i32, i32, i32) {
    %c0_i32 = arith.constant 0 : i32
    %c0_i32_0 = arith.constant 0 : i32
    %c0_i32_1 = arith.constant 0 : i32
    %c0_i32_2 = arith.constant 0 : i32
    return %arg0, %c0_i32, %c0_i32_0, %c0_i32_1 : i32, i32, i32, i32
  }
}

</mosaic_0001>

<bundles_post_ra>
// kernel: tpu_custom_call.1
= control target key start
LH: loop header
LB: loop body
LE: loop exit
PB: predicated region body
PF: predicated region fallthrough
CT: control target
= control target key end

     0   :  { %9 = vsyncpa [#allocation4], 0  ;;  %s1144_s0 = inlined_call_operand.vmem [shape: f32[2,200,4], index: 0, kind: input, shape index: {}]   ;;  %s1145_s1 = inlined_call_operand.vmem [shape: f32[2,200], index: 1, kind: input, shape index: {}]   ;;  %s1146_s2 = inlined_call_operand.vmem [shape: f32[2,16], index: 2, kind: input, shape index: {}]   ;;  %s1147_s3 = inlined_call_operand.vmem [shape: f32[16,2], index: 3, kind: input, shape index: {}]   ;;  %s1148_s4 = inlined_call_operand.hbm [shape: f32[2,2,16,16], index: 4, kind: output, shape index: {}]  }
   0x1   :  { %11 = vsyncpa [#allocation4 + $0x1], 0  ;;  %s965_s15 = smov 0   ;;  %s967_s16 = smov 0  }
   0x2   :  { %s969_s17 = smov 0   ;;  %s971_s18 = smov 0  }
   0x3 LB: > { %s986_s19 = sadd.s32 4294967295, %s931_s18   ;;  %s731_s20 = sadd.s32 4294967294, %s931_s18   ;;  %s931_s18 = sphi %s971_s18, %s1154_s18   ;;  %s927_s17 = sphi %s969_s17, %s1153_s17   ;;  %s923_s16 = sphi %s967_s16, %s1152_s16   ;;  %s919_s15 = sphi %s965_s15, %s1151_s15  }
   0x4   : > { %s990_s21 = sadd.s32 1, %s931_s18   ;;  %s113_s22 = sadd.s32 1, %s927_s17 }
   0x5   : > { %s110_s23 = ssub.s32 %s931_s18, %s990_s21  ;;  %p123_p0 = scmp.ne.s32.totalorder %s927_s17, %s923_s16 }
   0x6   : > { %p111_p1 = scmp.eq.s32.totalorder %s110_s23, 0  ;;  %p124_p2 = scmp.eq.s32.totalorder %s986_s19, 1 }
   0x7   : > { %p129_p3 = scmp.ne.s32.totalorder %s923_s16, %s919_s15  ;;  %p130_p4 = scmp.eq.s32.totalorder %s731_s20, 1 }
   0x8   : > { %s1001_s24 = scalar_select %p111_p1, %s927_s17, %s113_s22  }
   0x9   : > { %p1003_p5 = por %p124_p2, %p123_p0  ;;  %p1007_p6 = por %p130_p4, %p129_p3 }
   0xa   : > { %p734_p7 = scmp.ge.s32.totalorder %s931_s18, 1  ;;  %p165_p8 = scmp.lt.s32.totalorder %s931_s18, 3 }
   0xc   : > { %p166_p9 = pnand %p734_p7, %p165_p8 }
   0xd   : > { %p191_p10 = scmp.lt.s32.totalorder (!%p166_p9), %s986_s19, 1  ;;  %v933_v0 = vmov (!%p166_p9), 0.0|0.0   ;;  %v1018_v1 = vld.sshfl [vmem:[%s1145_s1] sm:$0x33 pattern:$0x76325410] (!%p166_p9) }
   0xe   : > { %169 = sbr.rel (%p166_p9) target bundleno = 862 (0x35e), region = 36  ;;  %787 = vmatprep.subr.bf16.mxu0 (!%p166_p9), %v933_v0  ;;  %vm232_vm0 = vcmask (!%p166_p9), 588800   ;;  %v934_v2 = vmov (!%p166_p9), 0.0   ;;  %v230_v3 = vcombine.high (!%p166_p9), %v1018_v1, %v1018_v1  ;;  %v305_v41 = vld [vmem:[%s1146_s2] sm:$0x3] (!%p166_p9)  ;;  %vm310_vm1 = vcmask (!%p166_p9), 1041408  }
   0xf   : > { %767 = vmatprep.subr.mxu1 (!%p166_p9), %v934_v2  ;;  %vm935_vm2 = vmmov (!%p166_p9), 0   ;;  %vm306_vm3 = vcmask (!%p166_p9), 15360   ;;  %v386_v42 = vld [vmem:[%s1146_s2] sm:$0x3] (!%p166_p9)  ;;  %s936_s12 = smov (!%p166_p9), 126   ;;  %vm384_vm4 = vcmask (!%p166_p9), 123904  }
  0x10   : > { %738 = vmatprep.mubr.msk.f32.mxu0 (!%p166_p9), %vm232_vm0, %v230_v3  ;;  %768 = vmatpush3.msk.msra.mxu1 (!%p166_p9), %vm310_vm1, %v305_v41  ;;  %v466_v46 = vld [vmem:[%s1147_s3] sm:$0xff] (!%p166_p9)  ;;  %vm473_vm5 = vcmask (!%p166_p9), 1041409   ;;  %v467_v57 = vld [vmem:[%s1147_s3 + $0x8] sm:$0xff] (!%p166_p9)  ;;  %s188_s23 = sand.u32 (!%p166_p9), 1, %s923_s16   ;;  %vm558_vm6 = vcmask (!%p166_p9), 130048   ;;  %s937_s9 = smov (!%p166_p9), [#allocation3]  }
  0x11   : > { %769 = vmatprep.mubr.msk.f32.mxu1 (!%p166_p9), %vm935_vm2, %v934_v2  ;;  %772 = vmatprep.subr.mxu1 (!%p166_p9), %v934_v2  ;;  %s735_s27 = sshll.u32 (!%p166_p9), %s188_s23, 5  ;;  %s1103_s8 = scalar_lea.sflag (!%p166_p9), [#allocation4], %s188_s23 }
  0x12   : > { %s190_s28 = scalar_lea.vmem (!%p166_p9), [#allocation3], %s735_s27  ;;  %s873_s10 = sshll.u32 (!%p166_p9), %s937_s9, 4  ;;  %s874_s10 = int_to_ptr.vmem [resolvable:$false] %s873_s10 }
  0x13   : > { %s875_s11 = scalar_lea.vmem (!%p166_p9), %s874_s10, 1024 }
  0x15   : > { %s192_s29 = scalar_select %p191_p10, %s986_s19, 1 }
  0x17   : > { %s823_s30 = smul.u32 200, %s192_s29  ;;  %s669_s29 = sshll.u32 %s190_s28, 4  ;;  %s1096_s29 = int_to_ptr.vmem [resolvable:$true] %s669_s29 }
  0x18   : > { %p876_p0 = scmp.lt.s32.totalorder %s1096_s29, %s874_s10 }
  0x19   : > { %s1027_s7 = scalar_lea.vmem %s1144_s0, %s823_s30  ;;  %s756_s30 = sshll.u32 %s986_s19, 9 }
  0x1a   : > { %v197_v4 = vld [vmem:[%s1027_s7] sm:$0xff]  ;;  %v198_v5 = vld [vmem:[%s1027_s7 + $0x8] sm:$0xff]  ;;  %v199_v6 = vld [vmem:[%s1027_s7 + $0x10] sm:$0xff]  ;;  %s869_s19 = scalar_lea.vmem %s1096_s29, 512 }
  0x1b   : > { %v788_v7 = vpack.c.bf16 %v198_v5, %v197_v4  ;;  %v200_v8 = vld [vmem:[%s1027_s7 + $0x18] sm:$0xff]  ;;  %v201_v10 = vld [vmem:[%s1027_s7 + $0x20] sm:$0xff]  ;;  %v202_v11 = vld [vmem:[%s1027_s7 + $0x28] sm:$0xff]  ;;  %p870_p11 = scmp.ne.s32.totalorder %s1096_s29, %s869_s19  ;;  %p877_p1 = scmp.lt.s32.totalorder %s875_s11, %s869_s19 }
  0x1c   : > { %v791_v9 = vpack.c.bf16 %v200_v8, %v199_v6  ;;  %v794_v12 = vpack.c.bf16 %v202_v11, %v201_v10  ;;  %v203_v13 = vld [vmem:[%s1027_s7 + $0x30] sm:$0xff]  ;;  %v204_v14 = vld [vmem:[%s1027_s7 + $0x38] sm:$0xff]  ;;  %v205_v16 = vld [vmem:[%s1027_s7 + $0x40] sm:$0xff] }
  0x1d   : > { %789 = vmatpush1.bf16.msra.mxu0 %v788_v7  ;;  %v797_v15 = vpack.c.bf16 %v204_v14, %v203_v13  ;;  %v206_v17 = vld [vmem:[%s1027_s7 + $0x48] sm:$0xff]  ;;  %v207_v19 = vld [vmem:[%s1027_s7 + $0x50] sm:$0xff]  ;;  %v208_v20 = vld [vmem:[%s1027_s7 + $0x58] sm:$0xff]  ;;  %p871_p12 = pnand %p870_p11, %p1003_p5  ;;  %p878_p2 = por %p877_p1, %p876_p0 }
  0x1e   : > { %790 = vmatprep.subr.bf16.mxu0 %v933_v0  ;;  %v800_v18 = vpack.c.bf16 %v206_v17, %v205_v16  ;;  %v803_v21 = vpack.c.bf16 %v208_v20, %v207_v19  ;;  %v209_v22 = vld [vmem:[%s1027_s7 + $0x60] sm:$0xff]  ;;  %v210_v23 = vld [vmem:[%s1027_s7 + $0x68] sm:$0xff]  ;;  %v211_v25 = vld [vmem:[%s1027_s7 + $0x70] sm:$0xff] }
  0x1f   : > { %v806_v24 = vpack.c.bf16 %v210_v23, %v209_v22  ;;  %v212_v26 = vld [vmem:[%s1027_s7 + $0x78] sm:$0xff]  ;;  %v213_v28 = vld [vmem:[%s1027_s7 + $0x80] sm:$0xff]  ;;  %v214_v29 = vld [vmem:[%s1027_s7 + $0x88] sm:$0xff]  ;;  %p872_p13 = pneg %p871_p12 }
  0x20   : > { %v809_v27 = vpack.c.bf16 %v212_v26, %v211_v25  ;;  %v812_v30 = vpack.c.bf16 %v214_v29, %v213_v28  ;;  %v215_v31 = vld [vmem:[%s1027_s7 + $0x90] sm:$0xff]  ;;  %v216_v32 = vld [vmem:[%s1027_s7 + $0x98] sm:$0xff]  ;;  %v217_v34 = vld [vmem:[%s1027_s7 + $0xa0] sm:$0xff] }
  0x21   : > { %792 = vmatpush1.bf16.msra.mxu0 %v791_v9  ;;  %v815_v33 = vpack.c.bf16 %v216_v32, %v215_v31  ;;  %v218_v35 = vld [vmem:[%s1027_s7 + $0xa8] sm:$0xff]  ;;  %v219_v37 = vld [vmem:[%s1027_s7 + $0xb0] sm:$0xff]  ;;  %v220_v38 = vld [vmem:[%s1027_s7 + $0xb8] sm:$0xff]  ;;  %p879_p3 = pnand %p878_p2, %p872_p13 }
  0x22   : > { %793 = vmatprep.subr.bf16.mxu0 %v933_v0  ;;  %v818_v36 = vpack.c.bf16 %v218_v35, %v217_v34  ;;  %v821_v39 = vpack.c.bf16 %v220_v38, %v219_v37  ;;  %v221_v40 = vld [vmem:[%s1027_s7 + $0xc0] sm:$0xff]  ;;  %s1101_s7 = scalar_lea.hbm %s1148_s4, %s756_s30 }
  0x25   : > { %795 = vmatpush1.bf16.msra.mxu0 %v794_v12 }
  0x26   : > { %796 = vmatprep.subr.bf16.mxu0 %v933_v0 }
  0x29   : > { %798 = vmatpush1.bf16.msra.mxu0 %v797_v15 }
  0x2a   : > { %799 = vmatprep.subr.bf16.mxu0 %v933_v0 }
  0x2d   : > { %801 = vmatpush1.bf16.msra.mxu0 %v800_v18 }
  0x2e   : > { %802 = vmatprep.subr.bf16.mxu0 %v933_v0 }
  0x31   : > { %804 = vmatpush1.bf16.msra.mxu0 %v803_v21 }
  0x32   : > { %805 = vmatprep.subr.bf16.mxu0 %v933_v0 }
  0x35   : > { %807 = vmatpush1.bf16.msra.mxu0 %v806_v24 }
  0x36   : > { %808 = vmatprep.subr.bf16.mxu0 %v933_v0 }
  0x39   : > { %810 = vmatpush1.bf16.msra.mxu0 %v809_v27 }
  0x3a   : > { %811 = vmatprep.subr.bf16.mxu0 %v933_v0 }
  0x3d   : > { %813 = vmatpush1.bf16.msra.mxu0 %v812_v30 }
  0x3e   : > { %814 = vmatprep.subr.bf16.mxu0 %v933_v0 }
  0x41   : > { %816 = vmatpush1.bf16.msra.mxu0 %v815_v33 }
  0x42   : > { %817 = vmatprep.subr.bf16.mxu0 %v933_v0 }
  0x45   : > { %819 = vmatpush1.bf16.msra.mxu0 %v818_v36 }
  0x46   : > { %820 = vmatprep.subr.bf16.mxu0 %v933_v0 }
  0x49   : > { %822 = vmatpush1.bf16.msra.mxu0 %v821_v39 }
  0x4a   : > { %283 = vmatprep.subr.mxu0 %v934_v2 }
  0x4d   : > { %284 = vmatpush1.msra.mxu0 %v221_v40 }
  0x4e   : > { %300 = vmatmul.mubr.f32.vlgmr.msra.gmra.mrb[0].mxu0 %v1018_v1 }
 0x121   : > { %v301_v43 = vpop.f32.mrb[0].mxu0 }
 0x122   : > { %v303_v44 = vpop.f32.mrb[1].mxu0  ;;  %770 = vmatmul.mubr.msk.f32.vlgmr.msra.gmra.mrb[0].mxu1 %vm306_vm3, %v301_v43  ;;  %387 = vrot.lane.b32.xlu0 %v301_v43, %s936_s12 }
 0x123   : > { %773 = vmatpush3.msk.msra.mxu1 %vm310_vm1, %v386_v42  ;;  %774 = vmatprep.mubr.msk.f32.mxu1 %vm935_vm2, %v934_v2 }
 0x194   : > { %v388_v45 = vpop.permute.xlu0 %387 }
 0x195   : > { %775 = vmatmul.mubr.msk.f32.vlgmr.msra.gmra.mrb[2].mxu1 %vm306_vm3, %v388_v45 }
 0x196   : > { %779 = vmatprep.mubr.msk.f32.mxu1 %vm306_vm3, %v466_v46 }
 0x1f5   : > { %v380_v47 = vpop.f32.mrb[0].mxu1 }
 0x1f6   : > { %385 = vst.msk [vmem:[#allocation2] sm:$0x3] %vm384_vm4, %v380_v47  ;;  %v771_v48 = vpop.f32.mrb[1].mxu1 }
 0x1fd   : > { %v468_v55 = vld [vmem:[#allocation2] sm:$0x1]  ;;  %v563_v58 = vld [vmem:[#allocation2 + $0x1] sm:$0x1] }
 0x268   : > { %v460_v49 = vpop.f32.mrb[2].mxu1 }
 0x269   : > { %465 = vst.msk [vmem:[#allocation2 + $0x2] sm:$0x3] %vm384_vm4, %v460_v49  ;;  %v776_v50 = vpop.f32.mrb[3].mxu1 }
 0x270   : > { %v469_v51 = vld [vmem:[#allocation2 + $0x2] sm:$0x1]  ;;  %v564_v52 = vld [vmem:[#allocation2 + $0x3] sm:$0x1] }
 0x271   : > { %v472_v53 = vrot.slane %v469_v51, 7  ;;  %v567_v54 = vrot.slane %v564_v52, 7 }
 0x273   : > { %v474_v56 = vsel %vm473_vm5, %v472_v53, %v468_v55  ;;  %v568_v59 = vsel %vm473_vm5, %v567_v54, %v563_v58 }
 0x274   : > { %777 = vmatprep.subr.msk.mxu1 %vm310_vm1, %v474_v56 }
 0x275   : > { %778 = vmatpush3.msk.msra.mxu1 %vm310_vm1, %v474_v56 }
 0x276   : > { %782 = vmatprep.subr.msk.mxu1 %vm310_vm1, %v568_v59  ;;  %780 = vmatmul.mubr.msk.f32.vlgmr.msra.gmra.mrb[4].mxu1 %vm306_vm3, %v467_v57 }
 0x277   : > { %783 = vmatpush3.msk.msra.mxu1 %vm310_vm1, %v568_v59  ;;  %784 = vmatprep.mubr.msk.f32.mxu1 %vm306_vm3, %v466_v46 }
 0x27a   : > { %785 = vmatmul.mubr.msk.f32.vlgmr.msra.gmra.mrb[6].mxu1 %vm306_vm3, %v467_v57 }
 0x349   : > { %v781_v60 = vpop.f32.mrb[4].mxu1 }
 0x34a   : > { %560 = vst.msk [vmem:[%s190_s28 + $0x8] sm:$0xff] %vm558_vm6, %v781_v60  ;;  %v549_v61 = vpop.f32.mrb[5].mxu1 }
 0x34b   : > { %559 = vst.msk [vmem:[%s190_s28] sm:$0xff] %vm558_vm6, %v549_v61 }
 0x34d   : > { %v786_v62 = vpop.f32.mrb[6].mxu1 }
 0x34e   : > { %750 = vst.msk [vmem:[%s190_s28 + $0x18] sm:$0xff] %vm558_vm6, %v786_v62  ;;  %v643_v63 = vpop.f32.mrb[7].mxu1 }
 0x34f   : > { %749 = vst.msk [vmem:[%s190_s28 + $0x10] sm:$0xff] %vm558_vm6, %v643_v63 }
 0x350   : > { %882 = shalt.err (!%p879_p3)
}
 0x351   : > { %s883_s12 = scalar_lea.hbm %s1101_s7, 512  ;;  %s887_s20 = scalar_lea.hbm %s1148_s4, 1024 }
 0x352   : > { %p884_p4 = scmp.ne.s32.totalorder %s1101_s7, %s883_s12  ;;  %p888_p9 = scmp.lt.u32.totalorder %s1101_s7, %s1148_s4 }
 0x353   : > { %p889_p10 = scmp.lt.u32.totalorder %s887_s20, %s883_s12  ;;  %p891_p12 = scmp.lt.u32.totalorder %s883_s12, %s1101_s7 }
 0x354   : > { %p885_p7 = pnand %p884_p4, %p1003_p5 }
 0x355   : > { %p890_p11 = por %p889_p10, %p888_p9 }
 0x356   : > { %p886_p8 = pneg %p885_p7 }
 0x357   : > { %p892_p13 = por %p891_p12, %p890_p11 }
 0x359   : > { %p893_p0 = pnand %p892_p13, %p886_p8 }
 0x35b   : > { %896 = shalt.err (!%p893_p0)
}
 0x35c   : > { %s938_s27 = smov 128   ;;  %s939_s28 = smov 8  }
 0x35d   : > { %824 = dma.vmem_to_hbm [thread:$0]  (%p1003_p5), %s1096_s29, 512, %s1101_s7, %s1103_s8, %s938_s27, %s938_s27, %s939_s28  }
 0x35e PF: > { %p830_p1 = scmp.ge.s32.totalorder %s931_s18, 2  ;;  %s684_s30 = sand.u32 1, %s919_s15  }
 0x35f   : > { %s685_s5 = scalar_lea.sflag [#allocation4], %s684_s30 }
 0x360   : > { %p827_p2 = pnand %p830_p1, %p1007_p6 }
 0x362   : > { %914 = dma.done.wait (!%p827_p2), %s685_s5, 512  }
 0x363   : > { %916 = vsyncadd (!%p827_p2), %s685_s5, 4294966784  ;;  %p14_p3 = scmp.ge.s32.totalorder %s990_s21, 4   ;;  %s1151_s15 = smov %s923_s16 }
 0x364   : > { %s1152_s16 = smov %s927_s17  ;;  %s1153_s17 = smov %s1001_s24 }
 0x365   : > { %s1154_s18 = smov %s990_s21  ;;  %16 = sbr.rel (!%p14_p3) target bundleno = 3 (0x3), region = 73 }
 0x36c   :  { %690 = vsyncpa [#allocation4], 1 }
 0x36d   :  { %692 = vsyncpa [#allocation4 + $0x1], 1 }

</bundles_post_ra>
